<compile_context>
chip_gen: v6e
topology: v6e:2x2x1
jax: 0.10.0
libtpu: 0.0.40
codegen_flags: <defaults>
</compile_context>

<pallas_src>
import functools
import math

import jax
import jax.numpy as jnp
from jax.experimental import pallas as pl
from jax.experimental.pallas import tpu as pltpu


def _lwf_ce_kernel(old_ref, new_ref, ce_ref, *, exp, eps, n_rows, ragged):
    # old_ref / new_ref : [TN, C] logits tile;  ce_ref : [TN, 1] per-row loss.
    old = old_ref[...].astype(jnp.float32)
    new = new_ref[...].astype(jnp.float32)
    tn, c = old.shape

    # Temperature-style exponent: p^exp / sum(p^exp) == softmax(exp * logits).
    if exp != 1.0:
        old = old * exp
        new = new * exp

    # Stable softmax pieces for both logit sets.
    m_old = jnp.max(old, axis=1, keepdims=True)
    e_old = jnp.exp(old - m_old)
    s_old = jnp.sum(e_old, axis=1, keepdims=True)

    m_new = jnp.max(new, axis=1, keepdims=True)
    e_new = jnp.exp(new - m_new)
    s_new = jnp.sum(e_new, axis=1, keepdims=True)

    # ce = -(p_new * log((softmax(old) + eps/C) / (1+eps))).sum(1)
    #    = log(s_old) + log1p(eps) - sum(e_new * log(e_old + (eps/C)*s_old)) / s_new
    # (sum(p_new) == 1 lets the per-row constants factor out of the sum; no
    #  materialized logp_old [TN,C] temp.)
    dot = jnp.sum(e_new * jnp.log(e_old + (eps / c) * s_old),
                  axis=1, keepdims=True)
    ce = jnp.log(s_old) + math.log1p(eps) - dot / s_new          # [TN, 1]

    if ragged:
        # Last block may read past the end of the input arrays; those rows hold
        # unspecified data.  They are never written back (out_shape is exactly
        # (N, 1)), but mask them to 0 so no NaN/Inf ever leaves the kernel.
        row = (pl.program_id(0) * tn
               + jax.lax.broadcasted_iota(jnp.int32, (tn, 1), 0))
        ce = jnp.where(row < n_rows, ce, 0.0)

    ce_ref[...] = ce.astype(ce_ref.dtype)


def lwf_cross_entropy(output_old, output_new, *, exp=1.0, size_average=True,
                      eps=1e-5, block_rows=None):
    """Pallas TPU implementation of the LwF CrossEntropyLoss forward pass."""
    assert output_old.shape == output_new.shape and output_old.ndim == 2
    n, c = output_old.shape
    itemsize = jnp.dtype(output_old.dtype).itemsize

    # Sublane alignment for the row tile: 8 (f32), 16 (bf16/f16), 32 (int8/fp8).
    align = {4: 8, 2: 16, 1: 32}.get(itemsize, 8)
    n_aligned = align * ((n + align - 1) // align)

    # VMEM budget per tile row:
    #   2 inputs x 2 pipeline buffers x C x itemsize   (DMA buffers)
    # + ~20 B/elem of live f32 temps inside the kernel (e_old, e_new, log arg, ...)
    # + a few bytes for the (tn,1) output double-buffer.
    vmem_limit = 48 * 1024 * 1024          # safe on v5e/v6e/v7x (v7x has 64 MiB)
    vmem_budget = 32 * 1024 * 1024         # headroom below the limit
    if block_rows is None:
        per_row_bytes = 4 * c * itemsize + 20 * c + 16
        tn = max(align, (vmem_budget // per_row_bytes) // align * align)
        tn = min(tn, 32768)                # sanity cap; >>85%-roofline knee
        # Keep at least 2 grid tiles when rows allow it (v7x dual-TC sharding).
        if n >= 2 * align:
            half = align * ((((n + 1) // 2) + align - 1) // align)
            tn = min(tn, half)
    else:
        tn = max(align, (int(block_rows) // align) * align)
    tn = min(tn, n_aligned)

    grid = pl.cdiv(n, tn)
    ragged = (n % tn) != 0

    kernel = functools.partial(_lwf_ce_kernel, exp=float(exp), eps=float(eps),
                               n_rows=n, ragged=ragged)

    cost = pl.CostEstimate(
        flops=10 * n * c,
        transcendentals=3 * n * c,
        bytes_accessed=2 * n * c * itemsize + 4 * n,
    )

    ce = pl.pallas_call(
        kernel,
        out_shape=jax.ShapeDtypeStruct((n, 1), jnp.float32),
        grid_spec=pltpu.PrefetchScalarGridSpec(
            num_scalar_prefetch=0,
            grid=(grid,),
            in_specs=[
                pl.BlockSpec((tn, c), lambda i: (i, 0)),
                pl.BlockSpec((tn, c), lambda i: (i, 0)),
            ],
            out_specs=pl.BlockSpec((tn, 1), lambda i: (i, 0)),
        ),
        compiler_params=pltpu.CompilerParams(
            dimension_semantics=("parallel",),
            vmem_limit_bytes=vmem_limit,
        ),
        cost_estimate=cost,
    )(output_old, output_new)

    ce = ce[:, 0]                           # shape [N]
    if size_average:
        return jnp.mean(ce)                 # mean in the wrapper (grid stays parallel)
    return ce


def _reference(output_old, output_new, exp=1.0, size_average=True, eps=1e-5):
    """Pure-JAX reference mirroring the PyTorch module, for self-check."""
    p_old = jax.nn.softmax(output_old.astype(jnp.float32), axis=1)
    p_new = jax.nn.softmax(output_new.astype(jnp.float32), axis=1)
    if exp != 1.0:
        p_old = p_old ** exp
        p_old = p_old / p_old.sum(1, keepdims=True)
        p_new = p_new ** exp
        p_new = p_new / p_new.sum(1, keepdims=True)
    p_old = p_old + eps / output_old.shape[1]
    p_old = p_old / p_old.sum(1, keepdims=True)
    ce = -(p_new * jnp.log(p_old)).sum(1)
    if size_average:
        ce = ce.mean()
    return ce


if __name__ == "__main__":
    key = jax.random.PRNGKey(0)
    k1, k2 = jax.random.split(key)
    N, C = 8, 32                        # small batch of logits (B, num_classes)
    output_old = jax.random.normal(k1, (N, C), dtype=jnp.float32)
    output_new = jax.random.normal(k2, (N, C), dtype=jnp.float32)

    # default: exp=1, size_average=True -> scalar mean loss
    loss = lwf_cross_entropy(output_old, output_new,
                             exp=1.0, size_average=True, eps=1e-5)
    jax.block_until_ready(loss)
    ref = _reference(output_old, output_new)
    assert jnp.allclose(loss, ref, rtol=1e-4, atol=1e-5), (loss, ref)

    # exp != 1, per-sample losses
    loss2 = lwf_cross_entropy(output_old, output_new,
                              exp=0.5, size_average=False, eps=1e-5)
    jax.block_until_ready(loss2)
    ref2 = _reference(output_old, output_new, exp=0.5, size_average=False)
    assert jnp.allclose(loss2, ref2, rtol=1e-4, atol=1e-5), (loss2, ref2)

    # exercise the multi-tile / ragged-last-block path (no jnp.pad, masked tail),
    # with bf16 inputs and 16-row-aligned tiles.
    N2, C2 = 100, 256
    k3, k4 = jax.random.split(k2)
    big_old = jax.random.normal(k3, (N2, C2), dtype=jnp.bfloat16)
    big_new = jax.random.normal(k4, (N2, C2), dtype=jnp.bfloat16)
    loss3 = lwf_cross_entropy(big_old, big_new, exp=1.0, size_average=True,
                              eps=1e-5, block_rows=16)
    jax.block_until_ready(loss3)
    ref3 = _reference(big_old, big_new)
    assert jnp.allclose(loss3, ref3, rtol=1e-2, atol=1e-3), (loss3, ref3)

    # auto-tiling path on the same data (budget-derived tile, grid >= 2)
    loss4 = lwf_cross_entropy(big_old, big_new, exp=1.0, size_average=False)
    jax.block_until_ready(loss4)
    ref4 = _reference(big_old, big_new, size_average=False)
    assert jnp.allclose(loss4, ref4, rtol=1e-2, atol=1e-3)

    print("KERNEL_OK")
</pallas_src>

<mosaic_0001>
module attributes {stable_mosaic.version = 11 : i64} {
  func.func @_lwf_ce_kernel(%arg0: i32, %arg1: memref<8x32xf32, #tpu.memory_space<vmem>>, %arg2: memref<8x32xf32, #tpu.memory_space<vmem>>, %arg3: memref<8x1xf32, #tpu.memory_space<vmem>>) attributes {dimension_semantics = [#tpu.dimension_semantics<parallel>], iteration_bounds = array<i64: 1>, scalar_prefetch = 0 : i64, scratch_operands = 0 : i64, tpu.core_type = #tpu.core_type<tc>, window_params = [{transform_indices = @transform_0, window_bounds = array<i64: 8, 32>}, {transform_indices = @transform_1, window_bounds = array<i64: 8, 32>}, {transform_indices = @transform_2, window_bounds = array<i64: 8, 1>}]} {
    %c0 = arith.constant 0 : index
    %c0_0 = arith.constant 0 : index
    %0 = vector.load %arg1[%c0, %c0_0] : memref<8x32xf32, #tpu.memory_space<vmem>>, vector<8x32xf32>
    %c0_1 = arith.constant 0 : index
    %c0_2 = arith.constant 0 : index
    %1 = vector.load %arg2[%c0_1, %c0_2] : memref<8x32xf32, #tpu.memory_space<vmem>>, vector<8x32xf32>
    %cst = arith.constant dense<0xFF800000> : vector<8xf32>
    %2 = vector.multi_reduction <maximumf>, %0, %cst [1] : vector<8x32xf32> to vector<8xf32>
    %3 = vector.shape_cast %2 : vector<8xf32> to vector<8x1xf32>
    %4 = vector.broadcast %3 : vector<8x1xf32> to vector<8x32xf32>
    %5 = arith.subf %0, %4 : vector<8x32xf32>
    %6 = math.exp %5 : vector<8x32xf32>
    %cst_3 = arith.constant dense<0.000000e+00> : vector<8xf32>
    %7 = vector.multi_reduction <add>, %6, %cst_3 [1] : vector<8x32xf32> to vector<8xf32>
    %8 = vector.shape_cast %7 : vector<8xf32> to vector<8x1xf32>
    %cst_4 = arith.constant dense<0xFF800000> : vector<8xf32>
    %9 = vector.multi_reduction <maximumf>, %1, %cst_4 [1] : vector<8x32xf32> to vector<8xf32>
    %10 = vector.shape_cast %9 : vector<8xf32> to vector<8x1xf32>
    %11 = vector.broadcast %10 : vector<8x1xf32> to vector<8x32xf32>
    %12 = arith.subf %1, %11 : vector<8x32xf32>
    %13 = math.exp %12 : vector<8x32xf32>
    %cst_5 = arith.constant dense<0.000000e+00> : vector<8xf32>
    %14 = vector.multi_reduction <add>, %13, %cst_5 [1] : vector<8x32xf32> to vector<8xf32>
    %15 = vector.shape_cast %14 : vector<8xf32> to vector<8x1xf32>
    %cst_6 = arith.constant 3.125000e-07 : f32
    %16 = vector.broadcast %cst_6 : f32 to vector<8x1xf32>
    %17 = arith.mulf %16, %8 : vector<8x1xf32>
    %18 = vector.broadcast %17 : vector<8x1xf32> to vector<8x32xf32>
    %19 = arith.addf %6, %18 : vector<8x32xf32>
    %20 = math.log %19 : vector<8x32xf32>
    %21 = arith.mulf %13, %20 : vector<8x32xf32>
    %cst_7 = arith.constant dense<0.000000e+00> : vector<8xf32>
    %22 = vector.multi_reduction <add>, %21, %cst_7 [1] : vector<8x32xf32> to vector<8xf32>
    %23 = vector.shape_cast %22 : vector<8xf32> to vector<8x1xf32>
    %24 = math.log %8 : vector<8x1xf32>
    %cst_8 = arith.constant 9.99994972E-6 : f32
    %25 = vector.broadcast %cst_8 : f32 to vector<8x1xf32>
    %26 = arith.addf %24, %25 : vector<8x1xf32>
    %27 = arith.divf %23, %15 : vector<8x1xf32>
    %28 = arith.subf %26, %27 : vector<8x1xf32>
    %c0_9 = arith.constant 0 : index
    %c0_10 = arith.constant 0 : index
    %29 = vector.load %arg3[%c0_9, %c0_10] : memref<8x1xf32, #tpu.memory_space<vmem>>, vector<8x1xf32>
    tpu.vector_store %arg3[%c0_9, %c0_10], %28 {strides = array<i32>} : memref<8x1xf32, #tpu.memory_space<vmem>>, vector<8x1xf32>,
    return
  }
  func.func @transform_0(%arg0: i32) -> (i32, i32) {
    %c0_i32 = arith.constant 0 : i32
    %c0_i32_0 = arith.constant 0 : i32
    return %arg0, %c0_i32 : i32, i32
  }
  func.func @transform_1(%arg0: i32) -> (i32, i32) {
    %c0_i32 = arith.constant 0 : i32
    %c0_i32_0 = arith.constant 0 : i32
    return %arg0, %c0_i32 : i32, i32
  }
  func.func @transform_2(%arg0: i32) -> (i32, i32) {
    %c0_i32 = arith.constant 0 : i32
    %c0_i32_0 = arith.constant 0 : i32
    return %arg0, %c0_i32 : i32, i32
  }
}

</mosaic_0001>

<bundles_post_ra>
// kernel: tpu_custom_call.1
= control target key start
LH: loop header
LB: loop body
LE: loop exit
PB: predicated region body
PF: predicated region fallthrough
CT: control target
= control target key end

     0   :  { %7 = vsyncpa [#allocation3], 0  ;;  %s165_s0 = inlined_call_operand.hbm [shape: f32[8,32], index: 0, kind: input, shape index: {}]   ;;  %s166_s1 = inlined_call_operand.hbm [shape: f32[8,32], index: 1, kind: input, shape index: {}]   ;;  %s167_s2 = inlined_call_operand.vmem [shape: f32[8,1], index: 2, kind: output, shape index: {}]  }
   0x1   :  { %8 = vsyncpa [#allocation5], 0  ;;  %s134_s9 = smov [#allocation2]   ;;  %s135_s11 = smov [#allocation4]  }
   0x2   :  { %s15_s10 = sshll.u32 %s134_s9, 4  ;;  %s25_s12 = sshll.u32 %s135_s11, 4  ;;  %s16_s10 = int_to_ptr.vmem [resolvable:$true] %s15_s10  ;;  %s26_s12 = int_to_ptr.vmem [resolvable:$true] %s25_s12 }
   0x3   :  { %s98_s13 = scalar_lea.vmem %s16_s10, 128  ;;  %p103_p1 = scmp.lt.s32.totalorder %s16_s10, %s16_s10 }
   0x4   :  { %p99_p0 = scmp.ne.s32.totalorder %s16_s10, %s98_s13  ;;  %p104_p2 = scmp.lt.s32.totalorder %s98_s13, %s98_s13 }
   0x6   :  { %p105_p3 = por %p104_p2, %p103_p1 }
   0x8   :  { %p106_p4 = pnand %p105_p3, %p99_p0 }
   0xa   :  { %109 = shalt.err (!%p106_p4)
}
   0xb   :  { %18 = dma.hbm_to_vmem [thread:$0]  %s165_s0, 128, %s16_s10, [#allocation3]  }
   0xc   :  { %s118_s16 = scalar_lea.vmem %s26_s12, 128  ;;  %p123_p6 = scmp.lt.s32.totalorder %s26_s12, %s26_s12 }
   0xd   :  { %p119_p5 = scmp.ne.s32.totalorder %s26_s12, %s118_s16  ;;  %p124_p7 = scmp.lt.s32.totalorder %s118_s16, %s118_s16 }
   0xf   :  { %p125_p8 = por %p124_p7, %p123_p6 }
  0x11   :  { %p126_p9 = pnand %p125_p8, %p119_p5 }
  0x13   :  { %129 = shalt.err (!%p126_p9)
}
  0x14   :  { %28 = dma.hbm_to_vmem [thread:$0]  %s166_s1, 128, %s26_s12, [#allocation5]  }
  0x15   :  { %130 = dma.done.wait [#allocation3], 128  }
  0x16   :  { %131 = vsyncadd [#allocation3], 4294967168 }
  0x17   :  { %132 = dma.done.wait [#allocation5], 128  }
  0x18   :  { %133 = vsyncadd [#allocation5], 4294967168  ;;  %vm37_vm0 = vcmask 261120   ;;  %v35_v0 = vld [vmem:[#allocation2] sm:$0xff]  ;;  %v36_v2 = vld [vmem:[#allocation4] sm:$0xff]  ;;  %vm70_vm1 = vcmask 7168  }
  0x19   :  { %v38_v1 = vsel %vm37_vm0, %v35_v0, -inf  ;;  %v47_v3 = vsel %vm37_vm0, %v36_v2, -inf }
  0x1a   :  { %39 = vmax.xlane.f32.xlu0 %v38_v1 }
  0x1e   :  { %48 = vmax.xlane.f32.xlu0 %v47_v3 }
  0xa3   :  { %v40_v4 = vpop.xlane.xlu0 %39 }
  0xa4   :  { %v41_v5 = vsub.f32 %v35_v0, %v40_v4 }
  0xa6   :  { %v42_v6 = vmul.f32 1.442695, %v41_v5 }
  0xa7   :  { %v49_v7 = vpop.xlane.xlu0 %48 }
  0xa8   :  { %80 = vpow2.f32 %v42_v6  ;;  %v50_v8 = vsub.f32 %v36_v2, %v49_v7 }
  0xaa   :  { %v51_v11 = vmul.f32 1.442695, %v50_v8 }
  0xac   :  { %82 = vpow2.f32 %v51_v11 }
  0xb5   :  { %v81_v9 = vpop.eup %80 }
  0xb6   :  { %v44_v10 = vsel %vm37_vm0, %v81_v9, 0.0 }
  0xb7   :  { %45 = vadd.xlane.f32.xlu1 %v44_v10 }
  0xb9   :  { %v83_v12 = vpop.eup %82 }
  0xba   :  { %v53_v13 = vsel %vm37_vm0, %v83_v12, 0.0 }
  0xbb   :  { %54 = vadd.xlane.f32.xlu1 %v53_v13 }
 0x140   :  { %v46_v14 = vpop.xlane.xlu1 %45 }
 0x141   :  { %v56_v15 = vmul.f32 3.125e-07, %v46_v14 }
 0x143   :  { %v57_v16 = vadd.f32 %v81_v9, %v56_v15 }
 0x144   :  { %v55_v21 = vpop.xlane.xlu1 %54 }
 0x145   :  { %84 = vlog2.f32 %v57_v16 }
 0x146   :  { %86 = vlog2.f32 %v46_v14 }
 0x147   :  { %88 = vrcp.f32 %v55_v21 }
 0x152   :  { %v85_v17 = vpop.eup %84 }
 0x153   :  { %v59_v18 = vmul.f32 0.6931472, %v85_v17  ;;  %v87_v22 = vpop.eup %86 }
 0x154   :  { %v65_v23 = vmul.f32 0.6931472, %v87_v22  ;;  %v89_v24 = vpop.eup %88 }
 0x155   :  { %v60_v19 = vmul.f32 %v83_v12, %v59_v18 }
 0x156   :  { %v66_v26 = vadd.f32 9.99995e-06, %v65_v23 }
 0x157   :  { %v61_v20 = vsel %vm37_vm0, %v60_v19, 0.0 }
 0x158   :  { %62 = vadd.xlane.f32.xlu0 %v61_v20 }
 0x1e1   :  { %v63_v25 = vpop.xlane.xlu0 %62 }
 0x1e2   :  { %v68_v27 = vmul.f32 %v89_v24, %v63_v25 }
 0x1e4   :  { %v69_v28 = vsub.f32 %v66_v26, %v68_v27 }
 0x1e6   :  { %71 = vst.msk [vmem:[%s167_s2] sm:$0xff] %vm70_vm1, %v69_v28 }
 0x1e7   :  { %76 = vsyncpa [#allocation3], 1 }
 0x1e8   :  { %77 = vsyncpa [#allocation5], 1 }

</bundles_post_ra>
